<compile_context>
chip_gen: v7x
topology: tpu7x:2x2x1
jax: 0.10.0
libtpu: 0.0.40
codegen_flags: <defaults>
</compile_context>

<pallas_src>
import functools

import jax
import jax.numpy as jnp
from jax import lax
from jax.experimental import pallas as pl
from jax.experimental.pallas import tpu as pltpu

BN_EPS = 1e-5
LANE = 128
SUBLANE = 8


def _round_up(x, m):
    return (x + m - 1) // m * m


def cnn_block_kernel(p_ref, w_ref, gamma_ref, beta_ref, o_ref, *, inv_m):
    """Fused conv-as-matmul + BatchNorm (batch stats) + ReLU.

    p_ref:     (Mp, Kp) bf16  im2col patches (zero-padded rows / cols)
    w_ref:     (Kp, Cp) bf16  reshaped conv weight (zero-padded)
    gamma_ref: (1, Cp)  f32   BN weight (zero in padded channels)
    beta_ref:  (1, Cp)  f32   BN bias   (zero in padded channels)
    o_ref:     (Mp, Cp) f32   output, lane-dense (Cp is a multiple of 128)
    inv_m:     1 / true_M  (padded rows are all-zero so they drop out of sums)
    """
    # Conv hot path: bf16 MXU matmul with f32 accumulation. The conv bias is
    # omitted: it is cancelled exactly by the BatchNorm mean subtraction.
    conv = jnp.dot(p_ref[...], w_ref[...], preferred_element_type=jnp.float32)

    # Single-pass batch statistics over (N, H, W) == the M (sublane) axis.
    s1 = jnp.sum(conv, axis=0, keepdims=True)
    s2 = jnp.sum(conv * conv, axis=0, keepdims=True)
    mean = s1 * inv_m
    var = jnp.maximum(s2 * inv_m - mean * mean, 0.0)   # guard E[x^2]-mean^2 cancellation
    inv_std = lax.rsqrt(var + BN_EPS)                  # EUP slot, effectively free

    # BN folded to one per-channel FMA + ReLU.
    a = gamma_ref[...] * inv_std
    b = beta_ref[...] - mean * a
    o_ref[...] = jnp.maximum(conv * a + b, 0.0)


def im2col_nhwc(x_nhwc, k, stride):
    """Extract (M, kh*kw*C) patches, patch-offset-major / channel-minor order."""
    n, h, w, c = x_nhwc.shape
    ho = (h - k) // stride + 1
    wo = (w - k) // stride + 1
    pieces = []
    for i in range(k):
        for j in range(k):
            pieces.append(
                x_nhwc[:, i:i + stride * ho:stride, j:j + stride * wo:stride, :]
            )
    patches = jnp.stack(pieces, axis=-2)            # (N, Ho, Wo, k*k, C)
    return patches.reshape(n * ho * wo, k * k * c), ho, wo


def cnn_block_forward(x_nchw, conv_w, conv_b, bn_gamma, bn_beta, stride):
    """x_nchw: (N, C_in, H, W); conv_w: (C_out, C_in, kh, kw) (PyTorch layouts)."""
    del conv_b  # per-channel constant before BatchNorm is a mathematical no-op
    n, c_in, h, w = x_nchw.shape
    c_out, _, kh, kw = conv_w.shape
    assert kh == kw

    # TODO(synk): at production shapes, keep the surrounding graph NHWC and build the
    # patches on-chip (grid over (kh,kw) with accumulation) instead of materializing a
    # k*k-inflated im2col buffer and two layout transposes in HBM.
    x_nhwc = jnp.transpose(x_nchw, (0, 2, 3, 1))
    patches, ho, wo = im2col_nhwc(x_nhwc, kh, stride)     # (M, K)
    m, k_dim = patches.shape

    # Pad to TPU-friendly shapes: M and K to sublane multiples, C_out up to a full
    # 128-lane width (lane-dense output store, full MXU column use). All padding is
    # zeros and is sliced off below.
    m_p = _round_up(m, SUBLANE)
    k_p = _round_up(k_dim, SUBLANE)
    c_p = _round_up(max(c_out, LANE), LANE)

    # (C_out, C_in, kh, kw) -> (kh, kw, C_in, C_out) -> (K, C_out): matches the
    # (i, j, c) flattening order of im2col above.
    w_mat = jnp.transpose(conv_w, (2, 3, 1, 0)).reshape(k_dim, c_out)

    patches_p = jnp.pad(patches, ((0, m_p - m), (0, k_p - k_dim))).astype(jnp.bfloat16)
    w_p = jnp.pad(w_mat, ((0, k_p - k_dim), (0, c_p - c_out))).astype(jnp.bfloat16)
    g_row = jnp.pad(bn_gamma.reshape(1, c_out), ((0, 0), (0, c_p - c_out)))
    beta_row = jnp.pad(bn_beta.reshape(1, c_out), ((0, 0), (0, c_p - c_out)))

    kernel = functools.partial(cnn_block_kernel, inv_m=1.0 / m)

    # Whole (padded) problem fits comfortably in VMEM -> single grid point with
    # full-array blocks (the BN batch statistics need the full M axis in one shot).
    # TODO(synk): for large M, split into a stats pass (accumulate sum/sumsq over an
    # 'arbitrary' M grid axis) + a 'parallel' apply pass, with tiles sized for v7x's
    # 64 MiB VMEM.
    out_flat = pl.pallas_call(
        kernel,
        out_shape=jax.ShapeDtypeStruct((m_p, c_p), jnp.float32),
        in_specs=[
            pl.BlockSpec((m_p, k_p), lambda: (0, 0)),
            pl.BlockSpec((k_p, c_p), lambda: (0, 0)),
            pl.BlockSpec((1, c_p), lambda: (0, 0)),
            pl.BlockSpec((1, c_p), lambda: (0, 0)),
        ],
        out_specs=pl.BlockSpec((m_p, c_p), lambda: (0, 0)),
        # Actual footprint ~0.2 MiB; keep the cap well under v7x's 64 MiB physical VMEM.
        compiler_params=pltpu.CompilerParams(vmem_limit_bytes=16 << 20),
    )(patches_p, w_p, g_row, beta_row)

    out_nhwc = out_flat[:m, :c_out].reshape(n, ho, wo, c_out)
    return jnp.transpose(out_nhwc, (0, 3, 1, 2))        # back to NCHW


def reference_forward(x_nchw, conv_w, conv_b, bn_gamma, bn_beta, stride):
    """Pure-JAX f32 reference with the full module semantics (incl. conv bias)."""
    conv = lax.conv_general_dilated(
        x_nchw, conv_w, window_strides=(stride, stride), padding="VALID",
        dimension_numbers=("NCHW", "OIHW", "NCHW"),
    ) + conv_b.reshape(1, -1, 1, 1)
    mean = jnp.mean(conv, axis=(0, 2, 3), keepdims=True)
    var = jnp.mean((conv - mean) ** 2, axis=(0, 2, 3), keepdims=True)
    y = (conv - mean) * lax.rsqrt(var + BN_EPS)
    y = y * bn_gamma.reshape(1, -1, 1, 1) + bn_beta.reshape(1, -1, 1, 1)
    return jnp.maximum(y, 0.0)


if __name__ == "__main__":
    # CNN_Block(in_channels=4, out_channels=8, kernel_size=3, stride=2)
    N, C_IN, H, W = 2, 4, 16, 16
    C_OUT, K, STRIDE = 8, 3, 2

    key = jax.random.PRNGKey(0)
    kx, kw, kb = jax.random.split(key, 3)
    x = jax.random.normal(kx, (N, C_IN, H, W), dtype=jnp.float32)

    # Deterministic parameter init (shapes follow nn.Conv2d / nn.BatchNorm2d).
    fan_in = C_IN * K * K
    bound = 1.0 / jnp.sqrt(fan_in)
    conv_w = jax.random.uniform(kw, (C_OUT, C_IN, K, K), jnp.float32, -bound, bound)
    conv_b = jax.random.uniform(kb, (C_OUT,), jnp.float32, -bound, bound)
    bn_gamma = jnp.ones((C_OUT,), jnp.float32)   # BatchNorm2d default init
    bn_beta = jnp.zeros((C_OUT,), jnp.float32)

    out = cnn_block_forward(x, conv_w, conv_b, bn_gamma, bn_beta, STRIDE)
    out = jax.block_until_ready(out)

    ref = reference_forward(x, conv_w, conv_b, bn_gamma, bn_beta, STRIDE)
    assert out.shape == ref.shape == (N, C_OUT, (H - K) // STRIDE + 1, (W - K) // STRIDE + 1)
    # Tolerance is loosened vs. the pure-f32 reference because the kernel feeds
    # bf16 inputs to the MXU (f32 accumulation); BN/ReLU epilogue is exact f32.
    assert jnp.allclose(out, ref, rtol=5e-2, atol=5e-2)

    print("KERNEL_OK")
</pallas_src>

<mosaic_0001>
module attributes {stable_mosaic.version = 11 : i64} {
  func.func @cnn_block_kernel(%arg0: memref<104x40xbf16, #tpu.memory_space<vmem>>, %arg1: memref<40x128xbf16, #tpu.memory_space<vmem>>, %arg2: memref<1x128xf32, #tpu.memory_space<vmem>>, %arg3: memref<1x128xf32, #tpu.memory_space<vmem>>, %arg4: memref<104x128xf32, #tpu.memory_space<vmem>>) attributes {dimension_semantics = [], scalar_prefetch = 0 : i64, scratch_operands = 0 : i64, tpu.core_type = #tpu.core_type<tc>} {
    %c0 = arith.constant 0 : index
    %c0_0 = arith.constant 0 : index
    %0 = vector.load %arg0[%c0, %c0_0] : memref<104x40xbf16, #tpu.memory_space<vmem>>, vector<104x40xbf16>
    %c0_1 = arith.constant 0 : index
    %c0_2 = arith.constant 0 : index
    %1 = vector.load %arg1[%c0_1, %c0_2] : memref<40x128xbf16, #tpu.memory_space<vmem>>, vector<40x128xbf16>
    %cst = arith.constant dense<0.000000e+00> : vector<104x128xf32>
    %2 = tpu.matmul %0, %1, %cst {dimension_numbers = #tpu.dot_dimension_numbers<[1], [0], [0], [1], [0, 0, 1, 1], [], []>} : vector<104x40xbf16>, vector<40x128xbf16>, vector<104x128xf32> -> vector<104x128xf32>
    %cst_3 = arith.constant dense<0.000000e+00> : vector<128xf32>
    %3 = vector.multi_reduction <add>, %2, %cst_3 [0] : vector<104x128xf32> to vector<128xf32>
    %4 = vector.shape_cast %3 : vector<128xf32> to vector<1x128xf32>
    %5 = arith.mulf %2, %2 : vector<104x128xf32>
    %cst_4 = arith.constant dense<0.000000e+00> : vector<128xf32>
    %6 = vector.multi_reduction <add>, %5, %cst_4 [0] : vector<104x128xf32> to vector<128xf32>
    %7 = vector.shape_cast %6 : vector<128xf32> to vector<1x128xf32>
    %cst_5 = arith.constant 0.0102040814 : f32
    %8 = vector.broadcast %cst_5 : f32 to vector<1x128xf32>
    %9 = arith.mulf %4, %8 : vector<1x128xf32>
    %cst_6 = arith.constant 0.0102040814 : f32
    %10 = vector.broadcast %cst_6 : f32 to vector<1x128xf32>
    %11 = arith.mulf %7, %10 : vector<1x128xf32>
    %12 = arith.mulf %9, %9 : vector<1x128xf32>
    %13 = arith.subf %11, %12 : vector<1x128xf32>
    %cst_7 = arith.constant 0.000000e+00 : f32
    %14 = vector.broadcast %cst_7 : f32 to vector<1x128xf32>
    %15 = arith.maximumf %13, %14 : vector<1x128xf32>
    %cst_8 = arith.constant 9.99999974E-6 : f32
    %16 = vector.broadcast %cst_8 : f32 to vector<1x128xf32>
    %17 = arith.addf %15, %16 : vector<1x128xf32>
    %18 = math.rsqrt %17 : vector<1x128xf32>
    %c0_9 = arith.constant 0 : index
    %c0_10 = arith.constant 0 : index
    %19 = vector.load %arg2[%c0_9, %c0_10] : memref<1x128xf32, #tpu.memory_space<vmem>>, vector<1x128xf32>
    %20 = arith.mulf %19, %18 : vector<1x128xf32>
    %c0_11 = arith.constant 0 : index
    %c0_12 = arith.constant 0 : index
    %21 = vector.load %arg3[%c0_11, %c0_12] : memref<1x128xf32, #tpu.memory_space<vmem>>, vector<1x128xf32>
    %22 = arith.mulf %9, %20 : vector<1x128xf32>
    %23 = arith.subf %21, %22 : vector<1x128xf32>
    %24 = vector.broadcast %20 : vector<1x128xf32> to vector<104x128xf32>
    %25 = arith.mulf %2, %24 : vector<104x128xf32>
    %26 = vector.broadcast %23 : vector<1x128xf32> to vector<104x128xf32>
    %27 = arith.addf %25, %26 : vector<104x128xf32>
    %cst_13 = arith.constant 0.000000e+00 : f32
    %28 = vector.broadcast %cst_13 : f32 to vector<104x128xf32>
    %29 = arith.maximumf %27, %28 : vector<104x128xf32>
    %c0_14 = arith.constant 0 : index
    %c0_15 = arith.constant 0 : index
    %30 = vector.load %arg4[%c0_14, %c0_15] : memref<104x128xf32, #tpu.memory_space<vmem>>, vector<104x128xf32>
    tpu.vector_store %arg4[%c0_14, %c0_15], %29 {strides = array<i32>} : memref<104x128xf32, #tpu.memory_space<vmem>>, vector<104x128xf32>,
    return
  }
}

</mosaic_0001>

<bundles_post_ra>
// kernel: tpu_custom_call.1
= control target key start
LH: loop header
LB: loop body
LE: loop exit
PB: predicated region body
PF: predicated region fallthrough
CT: control target
= control target key end

     0   :  { %v448_v1 = vmov 0.0   ;;  %vm449_vm0 = vmmov 0   ;;  %vm107_vm1 = vcmask 1043456   ;;  %s613_s0 = inlined_call_operand.vmem [shape: bf16[104,40], index: 0, kind: input, shape index: {}]   ;;  %s614_s1 = inlined_call_operand.vmem [shape: bf16[40,128], index: 1, kind: input, shape index: {}]   ;;  %s615_s2 = inlined_call_operand.vmem [shape: f32[1,128], index: 2, kind: input, shape index: {}]   ;;  %s616_s3 = inlined_call_operand.vmem [shape: f32[1,128], index: 3, kind: input, shape index: {}]   ;;  %s617_s4 = inlined_call_operand.hbm [shape: f32[104,128], index: 4, kind: output, shape index: {}]  }
   0x1   :  { %v412_v0 = vld [vmem:[%s614_s1] sm:$0xff]   ;;  %367 = vmatprep.subr.bf16.mxu0 %v448_v1  ;;  %401 = vmatprep.subr.bf16.mxu1 %v448_v1  ;;  %v413_v2 = vld [vmem:[%s614_s1 + $0x8] sm:$0xff]   ;;  %v414_v3 = vld [vmem:[%s614_s1 + $0x10] ss:$0 sps:$4 sm:$0xff]  }
   0x2   :  { %368 = vmatpush3.bf16.msra.mxu0 %v412_v0  ;;  %404 = vmatpush3.bf16.msra.mxu1 %v412_v0  ;;  %v109_v4 = vsel %vm107_vm1, %v414_v3, 0  ;;  %v415_v5 = vld [vmem:[%s613_s0] sm:$0xff]  }
   0x3   :  { %369 = vmatprep.subr.bf16.mxu0 %v448_v1  ;;  %373 = vmatprep.mubr.msk.bf16.mxu0 %vm449_vm0, %v448_v1  ;;  %v418_v6 = vld [vmem:[%s613_s0 + $0x20] sm:$0xff]  }
   0x4   :  { %402 = vmatprep.subr.bf16.mxu1 %v448_v1  ;;  %389 = vmatprep.mubr.msk.bf16.mxu1 %vm449_vm0, %v448_v1 }
   0x6   :  { %370 = vmatpush3.bf16.msra.mxu0 %v413_v2  ;;  %405 = vmatpush3.bf16.msra.mxu1 %v413_v2 }
   0x7   :  { %371 = vmatprep.subr.bf16.mxu0 %v448_v1  ;;  %403 = vmatprep.subr.bf16.mxu1 %v448_v1 }
   0x8   :  { %9 = vsyncpa [#allocation3], 0  ;;  %vm85_vm2 = vcmask 326656   ;;  %v416_v7 = vld [vmem:[%s613_s0 + $0x8] sm:$0xff]   ;;  %v417_v9 = vld [vmem:[%s613_s0 + $0x10] sm:$0xff]  }
   0x9   :  { %v420_v8 = vld [vmem:[%s613_s0 + $0x28] sm:$0xff]   ;;  %v421_v10 = vld [vmem:[%s613_s0 + $0x30] ss:$0 sps:$4 sm:$0xff]   ;;  %v419_v11 = vld [vmem:[%s613_s0 + $0x18] sm:$0xff]  }
   0xa   :  { %372 = vmatpush3.bf16.msra.mxu0 %v109_v4  ;;  %406 = vmatpush3.bf16.msra.mxu1 %v109_v4 }
   0xd   :  { %374 = vmatmul.mubr.msk.bf16.vlgmr.msra.gmra.mrb[0].mxu0 %vm85_vm2, %v415_v5  ;;  %390 = vmatmul.mubr.msk.bf16.vlgmr.msra.gmra.mrb[0].mxu1 %vm85_vm2, %v418_v6 }
   0xe   :  { %377 = vmatprep.mubr.msk.bf16.mxu0 %vm449_vm0, %v448_v1  ;;  %393 = vmatprep.mubr.msk.bf16.mxu1 %vm449_vm0, %v448_v1 }
  0x15   :  { %378 = vmatmul.mubr.msk.bf16.gmra.mrb[4].mxu0 %vm85_vm2, %v416_v7  ;;  %394 = vmatmul.mubr.msk.bf16.gmra.mrb[4].mxu1 %vm85_vm2, %v420_v8 }
  0x16   :  { %381 = vmatprep.mubr.msk.bf16.mxu0 %vm449_vm0, %v448_v1  ;;  %397 = vmatprep.mubr.msk.bf16.mxu1 %vm449_vm0, %v448_v1 }
  0x1d   :  { %382 = vmatmul.mubr.msk.bf16.gmra.mrb[8].mxu0 %vm85_vm2, %v417_v9  ;;  %398 = vmatmul.mubr.msk.bf16.gmra.mrb[8].mxu1 %vm85_vm2, %v421_v10 }
  0x1e   :  { %385 = vmatprep.mubr.msk.bf16.mxu0 %vm449_vm0, %v448_v1 }
  0x25   :  { %386 = vmatmul.mubr.msk.bf16.gmra.mrb[12].mxu0 %vm85_vm2, %v419_v11 }
  0xe0   :  { %v522_v12 = vpop.f32.mrb[0].mxu0  ;;  %v524_v13 = vpop.f32.mrb[0].mxu1 }
  0xe1   :  { %v375_v14 = vpop.f32.mrb[1].mxu0  ;;  %v391_v15 = vpop.f32.mrb[1].mxu1  ;;  %v217_v18 = vmul.f32 %v522_v12, %v522_v12  ;;  %v225_v61 = vmul.f32 %v524_v13, %v524_v13 }
  0xe2   :  { %v526_v16 = vpop.f32.mrb[2].mxu0  ;;  %v528_v17 = vpop.f32.mrb[2].mxu1 }
  0xe3   :  { %v199_v19 = vadd.f32 %v526_v16, %v522_v12  ;;  %v218_v20 = vmul.f32 %v526_v16, %v526_v16  ;;  %v376_v21 = vpop.f32.mrb[3].mxu0  ;;  %v392_v22 = vpop.f32.mrb[3].mxu1  ;;  %v226_v0 = vmul.f32 %v528_v17, %v528_v17 }
  0xe5   :  { %v230_v23 = vadd.f32 %v218_v20, %v217_v18 }
  0xe8   :  { %v536_v24 = vpop.f32.mrb[4].mxu0  ;;  %v538_v25 = vpop.f32.mrb[4].mxu1 }
  0xe9   :  { %v200_v26 = vadd.f32 %v199_v19, %v536_v24  ;;  %v219_v27 = vmul.f32 %v536_v24, %v536_v24  ;;  %v379_v28 = vpop.f32.mrb[5].mxu0  ;;  %v395_v29 = vpop.f32.mrb[5].mxu1  ;;  %v227_v3 = vmul.f32 %v538_v25, %v538_v25 }
  0xea   :  { %v543_v30 = vpop.f32.mrb[6].mxu0  ;;  %v545_v31 = vpop.f32.mrb[6].mxu1 }
  0xeb   :  { %v231_v32 = vadd.f32 %v230_v23, %v219_v27  ;;  %v201_v33 = vadd.f32 %v200_v26, %v543_v30  ;;  %v220_v34 = vmul.f32 %v543_v30, %v543_v30  ;;  %v380_v35 = vpop.f32.mrb[7].mxu0  ;;  %v396_v36 = vpop.f32.mrb[7].mxu1  ;;  %v228_v7 = vmul.f32 %v545_v31, %v545_v31 }
  0xed   :  { %v232_v37 = vadd.f32 %v231_v32, %v220_v34 }
  0xf0   :  { %v550_v38 = vpop.f32.mrb[8].mxu0  ;;  %v552_v39 = vpop.f32.mrb[8].mxu1 }
  0xf1   :  { %v202_v40 = vadd.f32 %v201_v33, %v550_v38  ;;  %v221_v41 = vmul.f32 %v550_v38, %v550_v38  ;;  %v383_v42 = vpop.f32.mrb[9].mxu0  ;;  %v399_v43 = vpop.f32.mrb[9].mxu1  ;;  %v229_v9 = vmul.f32 %v552_v39, %v552_v39 }
  0xf2   :  { %v557_v44 = vpop.f32.mrb[10].mxu0  ;;  %v196_v45 = vpop.f32.mrb[10].mxu1  ;;  %v255_v43 = vld [vmem:[%s615_s2] sm:$0x1]  ;;  %s450_s2 = smov [#allocation2]  }
  0xf3   :  { %v233_v46 = vadd.f32 %v232_v37, %v221_v41  ;;  %v203_v47 = vadd.f32 %v202_v40, %v557_v44  ;;  %v222_v48 = vmul.f32 %v557_v44, %v557_v44  ;;  %v384_v49 = vpop.f32.mrb[11].mxu0  ;;  %v400_v50 = vpop.f32.mrb[11].mxu1  ;;  %v261_v41 = vlaneseq }
  0xf5   :  { %v234_v51 = vadd.f32 %v233_v46, %v222_v48  ;;  %v262_v42 = vshrl.u32 %v261_v41, 7  ;;  %v257_v48 = vld [vmem:[%s616_s3] sm:$0x1]  ;;  %s329_s3 = sshll.u32 %s450_s2, 4  ;;  %s594_s3 = int_to_ptr.vmem [resolvable:$true] %s329_s3 }
  0xf6   :  { %s424_s11 = scalar_lea.vmem %s594_s3, 1664  ;;  %p429_p1 = scmp.lt.s32.totalorder %s594_s3, %s594_s3 }
  0xf7   :  { %v263_v45 = vsub.s32 0, %v262_v42  ;;  %p425_p0 = scmp.ne.s32.totalorder %s594_s3, %s424_s11  ;;  %p430_p2 = scmp.lt.s32.totalorder %s424_s11, %s424_s11 }
  0xf8   :  { %v169_v52 = vpop.f32.mrb[12].mxu0 }
  0xf9   :  { %v204_v53 = vadd.f32 %v203_v47, %v169_v52  ;;  %v223_v54 = vmul.f32 %v169_v52, %v169_v52  ;;  %v387_v55 = vpop.f32.mrb[13].mxu0  ;;  %p431_p3 = por %p430_p2, %p429_p1 }
  0xfa   :  { %v172_v56 = vpop.f32.mrb[14].mxu0 }
  0xfb   :  { %v235_v57 = vadd.f32 %v234_v51, %v223_v54  ;;  %v205_v58 = vadd.f32 %v204_v53, %v172_v56  ;;  %v224_v59 = vmul.f32 %v172_v56, %v172_v56  ;;  %v388_v60 = vpop.f32.mrb[15].mxu0  ;;  %p432_p4 = pnand %p431_p3, %p425_p0 }
  0xfd   :  { %v206_v62 = vadd.f32 %v205_v58, %v524_v13  ;;  %v236_v63 = vadd.f32 %v235_v57, %v224_v59 }
  0xff   :  { %v237_v1 = vadd.f32 %v236_v63, %v225_v61  ;;  %v207_v2 = vadd.f32 %v206_v62, %v528_v17 }
 0x101   :  { %v208_v4 = vadd.f32 %v207_v2, %v538_v25  ;;  %v238_v5 = vadd.f32 %v237_v1, %v226_v0 }
 0x103   :  { %v209_v6 = vadd.f32 %v208_v4, %v545_v31  ;;  %v239_v8 = vadd.f32 %v238_v5, %v227_v3 }
 0x105   :  { %v240_v10 = vadd.f32 %v239_v8, %v228_v7  ;;  %v210_v11 = vadd.f32 %v209_v6, %v552_v39 }
 0x107   :  { %v211_v14 = vrot.slane %v210_v11, 4  ;;  %v241_v15 = vadd.f32 %v240_v10, %v229_v9 }
 0x109   :  { %v212_v18 = vadd.f32 %v211_v14, %v210_v11  ;;  %v242_v19 = vrot.slane %v241_v15, 4 }
 0x10b   :  { %v213_v20 = vrot.slane %v212_v18, 2  ;;  %v243_v21 = vadd.f32 %v242_v19, %v241_v15 }
 0x10d   :  { %v214_v22 = vadd.f32 %v213_v20, %v212_v18  ;;  %v244_v23 = vrot.slane %v243_v21, 2 }
 0x10f   :  { %v215_v26 = vrot.slane %v214_v22, 1  ;;  %v245_v27 = vadd.f32 %v244_v23, %v243_v21 }
 0x111   :  { %v216_v28 = vadd.f32 %v215_v26, %v214_v22  ;;  %v246_v29 = vrot.slane %v245_v27, 1 }
 0x113   :  { %v247_v32 = vadd.f32 %v246_v29, %v245_v27  ;;  %v248_v33 = vmul.f32 0.010204081, %v216_v28 }
 0x115   :  { %v249_v34 = vmul.f32 0.010204081, %v247_v32  ;;  %v250_v35 = vmul.f32 %v248_v33, %v248_v33 }
 0x117   :  { %v251_v36 = vsub.f32 %v249_v34, %v250_v35 }
 0x119   :  { %v252_v37 = vmax.f32 %v251_v36, 0.0 }
 0x11b   :  { %v253_v40 = vadd.f32 1e-05, %v252_v37 }
 0x11d   :  { %422 = vrsqrt.f32 %v253_v40 }
 0x127   :  { %v423_v46 = vpop.eup %422 }
 0x128   :  { %v256_v47 = vmul.f32 %v423_v46, %v255_v43 }
 0x12a   :  { %v258_v49 = vmul.f32 %v256_v47, %v248_v33  ;;  %v264_v50 = vrot.slane %v256_v47, %v263_v45 }
 0x12c   :  { %v259_v51 = vsub.f32 %v257_v48, %v258_v49  ;;  %v278_v53 = vmul.f32 %v264_v50, %v552_v39  ;;  %v266_v54 = vmul.f32 %v264_v50, %v522_v12  ;;  %v267_v55 = vmul.f32 %v264_v50, %v526_v16 }
 0x12d   :  { %v268_v57 = vmul.f32 %v264_v50, %v536_v24  ;;  %v269_v58 = vmul.f32 %v264_v50, %v543_v30  ;;  %v270_v59 = vmul.f32 %v264_v50, %v550_v38  ;;  %v271_v60 = vmul.f32 %v264_v50, %v557_v44 }
 0x12e   :  { %v283_v61 = vrot.slane %v259_v51, %v263_v45  ;;  %v272_v62 = vmul.f32 %v264_v50, %v169_v52  ;;  %v273_v63 = vmul.f32 %v264_v50, %v172_v56  ;;  %v274_v0 = vmul.f32 %v264_v50, %v524_v13 }
 0x12f   :  { %v275_v1 = vmul.f32 %v264_v50, %v528_v17  ;;  %v276_v39 = vmul.f32 %v264_v50, %v538_v25  ;;  %v277_v12 = vmul.f32 %v264_v50, %v545_v31 }
 0x130   :  { %v297_v16 = vadd.f32 %v283_v61, %v278_v53  ;;  %v285_v2 = vadd.f32 %v283_v61, %v266_v54  ;;  %v286_v24 = vadd.f32 %v283_v61, %v267_v55  ;;  %v287_v3 = vadd.f32 %v283_v61, %v268_v57 }
 0x131   :  { %v288_v30 = vadd.f32 %v283_v61, %v269_v58  ;;  %v289_v4 = vadd.f32 %v283_v61, %v270_v59  ;;  %v290_v38 = vadd.f32 %v283_v61, %v271_v60  ;;  %v291_v5 = vadd.f32 %v283_v61, %v272_v62 }
 0x132   :  { %v310_v44 = vmax.f32 %v297_v16, 0.0  ;;  %v292_v6 = vadd.f32 %v283_v61, %v273_v63  ;;  %v293_v52 = vadd.f32 %v283_v61, %v274_v0  ;;  %v294_v56 = vadd.f32 %v283_v61, %v275_v1 }
 0x133   :  { %v295_v13 = vadd.f32 %v283_v61, %v276_v39  ;;  %v296_v17 = vadd.f32 %v283_v61, %v277_v12  ;;  %v298_v7 = vmax.f32 %v285_v2, 0.0  ;;  %v299_v25 = vmax.f32 %v286_v24, 0.0 }
 0x134   :  { %323 = vst [vmem:[#allocation2 + $0x60] sm:$0xff] %v310_v44  ;;  %v300_v31 = vmax.f32 %v287_v3, 0.0  ;;  %v301_v8 = vmax.f32 %v288_v30, 0.0  ;;  %v302_v9 = vmax.f32 %v289_v4, 0.0  ;;  %v303_v10 = vmax.f32 %v290_v38, 0.0 }
 0x135   :  { %v304_v11 = vmax.f32 %v291_v5, 0.0  ;;  %v305_v14 = vmax.f32 %v292_v6, 0.0  ;;  %v306_v15 = vmax.f32 %v293_v52, 0.0  ;;  %v307_v18 = vmax.f32 %v294_v56, 0.0  ;;  %311 = vst [vmem:[#allocation2] sm:$0xff] %v298_v7  ;;  %312 = vst [vmem:[#allocation2 + $0x8] sm:$0xff] %v299_v25 }
 0x136   :  { %v308_v19 = vmax.f32 %v295_v13, 0.0  ;;  %v309_v20 = vmax.f32 %v296_v17, 0.0  ;;  %313 = vst [vmem:[#allocation2 + $0x10] sm:$0xff] %v300_v31  ;;  %314 = vst [vmem:[#allocation2 + $0x18] sm:$0xff] %v301_v8 }
 0x137   :  { %315 = vst [vmem:[#allocation2 + $0x20] sm:$0xff] %v302_v9  ;;  %316 = vst [vmem:[#allocation2 + $0x28] sm:$0xff] %v303_v10 }
 0x138   :  { %317 = vst [vmem:[#allocation2 + $0x30] sm:$0xff] %v304_v11  ;;  %318 = vst [vmem:[#allocation2 + $0x38] sm:$0xff] %v305_v14 }
 0x139   :  { %319 = vst [vmem:[#allocation2 + $0x40] sm:$0xff] %v306_v15  ;;  %320 = vst [vmem:[#allocation2 + $0x48] sm:$0xff] %v307_v18 }
 0x13a   :  { %321 = vst [vmem:[#allocation2 + $0x50] sm:$0xff] %v308_v19  ;;  %322 = vst [vmem:[#allocation2 + $0x58] sm:$0xff] %v309_v20 }
 0x13b   :  { %435 = shalt.err (!%p432_p4)
}
 0x13c   :  { %s436_s14 = scalar_lea.hbm %s617_s4, 1664 }
 0x13d   :  { %p437_p5 = scmp.ne.s32.totalorder %s617_s4, %s436_s14  ;;  %p440_p6 = scmp.lt.u32.totalorder %s436_s14, %s617_s4 }
 0x13f   :  { %p442_p7 = pnand %p440_p6, %p437_p5 }
 0x141   :  { %445 = shalt.err (!%p442_p7)
}
 0x142   :  { %s451_s19 = smov 128   ;;  %s452_s20 = smov 8  }
 0x143   :  { %335 = dma.vmem_to_hbm [thread:$0]  %s594_s3, 1664, %s617_s4, [#allocation3], %s451_s19, %s451_s19, %s452_s20  }
 0x144   :  { %446 = dma.done.wait [#allocation3], 1664  }
 0x145   :  { %447 = vsyncadd [#allocation3], 4294965632 }
 0x146   :  { %339 = vsyncpa [#allocation3], 1 }

</bundles_post_ra>
